<compile_context>
chip_gen: v6e
topology: v6e:2x2x1
jax: 0.10.0
libtpu: 0.0.40
codegen_flags: <defaults>
</compile_context>

<pallas_src>
import functools
import math

import jax
import jax.numpy as jnp
import numpy as np
from jax.experimental import pallas as pl
from jax.experimental.pallas import tpu as pltpu
from jax.scipy.linalg import block_diag


def _mhldsa_kernel(q_ref, v_ref, vh_ref, w1_ref, w2bd_ref, w2b_ref,
                   hmask_ref, selcat_ref, w3_ref, wo_ref, o_ref, *,
                   C, F, Tm):
    """One (batch, time-tile) pair per grid step.

    q_ref      : (Tm, F)          query tile (original dtype, cast here)
    v_ref      : (Tm, F)   bf16   padded-value rows [i*Tm, (i+1)*Tm)
    vh_ref     : (halo, F) bf16   padded-value rows [(i+1)*Tm, (i+1)*Tm+halo)
    w1/w3/wo   : (F, F)    bf16   projection weights (x @ W convention)
    w2bd       : (F, H*C)  bf16   block-diagonal grouped-conv weight
    w2b        : (1, H*C)  f32    grouped-conv bias
    hmask      : (H*C,H*C) bf16   same-head indicator (mean + denominators)
    selcat     : (H*C,C*F) bf16   fused head->lane broadcast selector
    o_ref      : (Tm, F)          output tile
    """
    # ---- score path: w1 -> relu -> block-diag "grouped conv" (+bias) ----
    q = q_ref[...].astype(jnp.bfloat16)
    q1 = jnp.dot(q, w1_ref[...], preferred_element_type=jnp.float32)
    r = jnp.maximum(q1, 0.0).astype(jnp.bfloat16)
    scores = jnp.dot(r, w2bd_ref[...],
                     preferred_element_type=jnp.float32) + w2b_ref[...]

    # ---- lane-dense per-head softmax over the context axis ----
    # Per-head mean (identical value for all C columns of a head, so the
    # softmax shift-invariance is exact); prevents cross-head underflow.
    mean = jnp.dot(scores.astype(jnp.bfloat16), hmask_ref[...],
                   preferred_element_type=jnp.float32) * (1.0 / C)
    centered = jnp.minimum(scores - mean, 80.0)          # overflow guard
    e = jnp.exp(centered)                                 # (Tm, H*C) f32
    denom = jnp.dot(e.astype(jnp.bfloat16), hmask_ref[...],
                    preferred_element_type=jnp.float32)   # >= 1 per column
    attn = e * pl.reciprocal(denom, approx=True)          # (Tm, H*C)
    # TODO(synk): attention dropout omitted (identity at inference / p=0).

    # ---- value path: w3 on the (Tm + halo, F) window ----
    vwin = jnp.concatenate([v_ref[...], vh_ref[...]], axis=0)   # bf16
    v3 = jnp.dot(vwin, w3_ref[...], preferred_element_type=jnp.float32)

    # ---- fused selector matmul: broadcast attn columns to d_k lanes ----
    a_all = jnp.dot(attn.astype(jnp.bfloat16), selcat_ref[...],
                    preferred_element_type=jnp.float32)   # (Tm, C*F)

    # ---- sliding-window weighted sum ----
    acc = a_all[:, 0:F] * v3[0:Tm, :]
    for ci in range(1, C):
        acc = acc + a_all[:, ci * F:(ci + 1) * F] * v3[ci:ci + Tm, :]

    # ---- output projection ----
    out = jnp.dot(acc.astype(jnp.bfloat16), wo_ref[...],
                  preferred_element_type=jnp.float32)
    o_ref[...] = out.astype(o_ref.dtype)


@functools.partial(jax.jit, static_argnames=("n_head", "context_size",
                                              "time_tile"))
def mhldsa_forward(query, value, w1, w2_w, w2_b, w3, w_out, *,
                   n_head, context_size, time_tile=256):
    """query/value: (B, T, F).  w1/w3/w_out: (F, F) applied as x @ W.
    w2_w: (H*C, DK) grouped-conv weight (kernel dim squeezed), w2_b: (H*C,)."""
    B, T, F = query.shape
    H, C = n_head, context_size
    assert F % H == 0
    assert C % 2 == 1, "context_size must be odd (as in the PyTorch module)"
    DK = F // H
    NL = (C - 1) // 2
    out_dtype = query.dtype

    # Time tiling: Tm rows per grid step; the value window adds an 8-aligned
    # `halo` block taken from the following rows of the padded value.
    Tm = T if T <= time_tile else time_tile
    assert T % Tm == 0, "T must be divisible by the time tile"
    nT = T // Tm
    halo = max(8, ((2 * NL + 7) // 8) * 8)
    assert Tm % halo == 0, "time tile must be a multiple of the 8-aligned halo"
    Tpad = (nT + 1) * Tm                 # main blocks + one spare zero tile
    th = Tm // halo

    # ---- constant operands built outside the kernel (all matmul operands
    # in bf16; they are exact 0/1 indicators or projection weights) ----
    w2_bd = block_diag(*[w2_w[h * C:(h + 1) * C, :].T for h in range(H)]
                       ).astype(jnp.bfloat16)                       # (F, H*C)
    w2_b2d = w2_b.astype(jnp.float32).reshape(1, H * C)
    head = np.arange(H * C) // C
    hmask = jnp.asarray((head[:, None] == head[None, :]).astype(np.float32),
                        dtype=jnp.bfloat16)                          # (HC, HC)
    # Fused selector: selcat[h*C+ci, ci*F + h*DK + d] = 1.
    selcat_np = np.zeros((H * C, C * F), np.float32)
    for ci in range(C):
        for h in range(H):
            selcat_np[h * C + ci,
                      ci * F + h * DK: ci * F + (h + 1) * DK] = 1.0
    selcat = jnp.asarray(selcat_np, dtype=jnp.bfloat16)

    w1_bf = w1.astype(jnp.bfloat16)
    w3_bf = w3.astype(jnp.bfloat16)
    wo_bf = w_out.astype(jnp.bfloat16)
    # value halo pad + bf16 cast fuse into one HBM pass under jit; query is
    # passed in its original dtype and cast to bf16 inside the kernel.
    vpad_bf = jnp.pad(value, ((0, 0), (NL, Tpad - T - NL), (0, 0))
                      ).astype(jnp.bfloat16)

    kernel = functools.partial(_mhldsa_kernel, C=C, F=F, Tm=Tm)
    wfull = lambda b, i: (0, 0)

    flops = 2 * B * T * (3 * F * F + F * H * C + 2 * (H * C) ** 2
                         + H * C * C * F)
    bytes_accessed = (B * T * F * query.dtype.itemsize        # query read
                      + 2 * B * Tpad * F                      # value read (bf16)
                      + 4 * B * T * F                          # output write
                      + 2 * (3 * F * F + F * H * C + (H * C) ** 2
                             + H * C * C * F)                  # bf16 constants
                      + 4 * H * C)                             # f32 bias
    cost = pl.CostEstimate(flops=int(flops),
                           transcendentals=int(B * T * H * C),
                           bytes_accessed=int(bytes_accessed))

    return pl.pallas_call(
        kernel,
        out_shape=jax.ShapeDtypeStruct((B, T, F), out_dtype),
        grid_spec=pltpu.PrefetchScalarGridSpec(
            num_scalar_prefetch=0,
            grid=(B, nT),
            in_specs=[
                pl.BlockSpec((None, Tm, F), lambda b, i: (b, i, 0)),     # query
                pl.BlockSpec((None, Tm, F), lambda b, i: (b, i, 0)),     # value main
                pl.BlockSpec((None, halo, F),
                             lambda b, i: (b, (i + 1) * th, 0)),         # value halo
                pl.BlockSpec((F, F), wfull),                             # w1
                pl.BlockSpec((F, H * C), wfull),                         # w2 blockdiag
                pl.BlockSpec((1, H * C), wfull),                         # w2 bias
                pl.BlockSpec((H * C, H * C), wfull),                     # head mask
                pl.BlockSpec((H * C, C * F), wfull),                     # fused selector
                pl.BlockSpec((F, F), wfull),                             # w3
                pl.BlockSpec((F, F), wfull),                             # w_out
            ],
            out_specs=pl.BlockSpec((None, Tm, F), lambda b, i: (b, i, 0)),
        ),
        compiler_params=pltpu.CompilerParams(
            dimension_semantics=("parallel", "parallel")),
        cost_estimate=cost,
    )(query, vpad_bf, vpad_bf, w1_bf, w2_bd, w2_b2d, hmask, selcat,
      w3_bf, wo_bf)


def mhldsa_reference(query, value, w1, w2_w, w2_b, w3, w_out, *,
                     n_head, context_size):
    """Pure-JAX f32 reference mirroring the PyTorch forward (eval mode)."""
    B, T, F = query.shape
    H, C = n_head, context_size
    DK = F // H
    NL = (C - 1) // 2
    hp = jax.lax.Precision.HIGHEST

    q1 = jnp.einsum('btf,fg->btg', query, w1, precision=hp)
    r = jnp.maximum(q1, 0.0)
    scores = jnp.zeros((B, T, H, C), jnp.float32)
    for h in range(H):
        rh = r[:, :, h * DK:(h + 1) * DK]                    # (B, T, DK)
        wh = w2_w[h * C:(h + 1) * C, :]                      # (C, DK)
        s = jnp.einsum('btd,cd->btc', rh, wh, precision=hp) + w2_b[h * C:(h + 1) * C]
        scores = scores.at[:, :, h, :].set(s)
    attn = jax.nn.softmax(scores, axis=-1)                   # (B, T, H, C)

    v1 = jnp.einsum('btf,fg->btg', value, w3, precision=hp)
    vpad = jnp.pad(v1, ((0, 0), (NL, NL), (0, 0)))
    out = jnp.zeros((B, T, F), jnp.float32)
    for h in range(H):
        for ci in range(C):
            out = out.at[:, :, h * DK:(h + 1) * DK].add(
                attn[:, :, h, ci:ci + 1] * vpad[:, ci:ci + T, h * DK:(h + 1) * DK])
    return jnp.einsum('btf,fg->btg', out, w_out, precision=hp)


if __name__ == "__main__":
    B, T, F = 2, 16, 32          # batch, time, n_feat
    H, C = 4, 3                  # n_head, context_size (odd)
    DK = F // H

    key = jax.random.PRNGKey(0)
    kq, kv, k1, k2, k2b, k3, ko = jax.random.split(key, 7)
    query = jax.random.normal(kq, (B, T, F), jnp.float32)
    value = jax.random.normal(kv, (B, T, F), jnp.float32)

    scale = 1.0 / math.sqrt(F)
    w1 = jax.random.normal(k1, (F, F), jnp.float32) * scale
    w2_w = jax.random.normal(k2, (H * C, DK), jnp.float32) * (1.0 / math.sqrt(DK))
    w2_b = jax.random.normal(k2b, (H * C,), jnp.float32) * 0.1
    w3 = jax.random.normal(k3, (F, F), jnp.float32) * scale
    w_out = jax.random.normal(ko, (F, F), jnp.float32) * scale

    ref = mhldsa_reference(query, value, w1, w2_w, w2_b, w3, w_out,
                           n_head=H, context_size=C)

    # Single time tile (Tm = T).
    out1 = jax.block_until_ready(
        mhldsa_forward(query, value, w1, w2_w, w2_b, w3, w_out,
                       n_head=H, context_size=C))
    # Tiled time axis (Tm = 8, two tiles) to exercise the halo-block path.
    out2 = jax.block_until_ready(
        mhldsa_forward(query, value, w1, w2_w, w2_b, w3, w_out,
                       n_head=H, context_size=C, time_tile=8))

    # bf16 MXU inputs vs HIGHEST-precision f32 reference -> loose tolerance.
    np.testing.assert_allclose(np.asarray(out1), np.asarray(ref),
                               rtol=5e-2, atol=5e-2)
    np.testing.assert_allclose(np.asarray(out2), np.asarray(ref),
                               rtol=5e-2, atol=5e-2)
    print("KERNEL_OK")
</pallas_src>

<mosaic_0001>
module attributes {stable_mosaic.version = 11 : i64} {
  func.func @_mhldsa_kernel(%arg0: i32, %arg1: i32, %arg2: memref<1x16x32xf32, #tpu.memory_space<vmem>>, %arg3: memref<1x16x32xbf16, #tpu.memory_space<vmem>>, %arg4: memref<1x8x32xbf16, #tpu.memory_space<vmem>>, %arg5: memref<32x32xbf16, #tpu.memory_space<vmem>>, %arg6: memref<32x12xbf16, #tpu.memory_space<vmem>>, %arg7: memref<1x12xf32, #tpu.memory_space<vmem>>, %arg8: memref<12x12xbf16, #tpu.memory_space<vmem>>, %arg9: memref<12x96xbf16, #tpu.memory_space<vmem>>, %arg10: memref<32x32xbf16, #tpu.memory_space<vmem>>, %arg11: memref<32x32xbf16, #tpu.memory_space<vmem>>, %arg12: memref<1x16x32xf32, #tpu.memory_space<vmem>>) attributes {dimension_semantics = [#tpu.dimension_semantics<parallel>, #tpu.dimension_semantics<parallel>], iteration_bounds = array<i64: 2, 1>, scalar_prefetch = 0 : i64, scratch_operands = 0 : i64, tpu.core_type = #tpu.core_type<tc>, window_params = [{transform_indices = @transform_0, window_bounds = array<i64: 1, 16, 32>}, {transform_indices = @transform_1, window_bounds = array<i64: 1, 16, 32>}, {transform_indices = @transform_2, window_bounds = array<i64: 1, 8, 32>}, {pipeline_mode = #tpu.pipeline_mode<synchronous>, transform_indices = @transform_3, window_bounds = array<i64: 32, 32>}, {pipeline_mode = #tpu.pipeline_mode<synchronous>, transform_indices = @transform_4, window_bounds = array<i64: 32, 12>}, {pipeline_mode = #tpu.pipeline_mode<synchronous>, transform_indices = @transform_5, window_bounds = array<i64: 1, 12>}, {pipeline_mode = #tpu.pipeline_mode<synchronous>, transform_indices = @transform_6, window_bounds = array<i64: 12, 12>}, {pipeline_mode = #tpu.pipeline_mode<synchronous>, transform_indices = @transform_7, window_bounds = array<i64: 12, 96>}, {pipeline_mode = #tpu.pipeline_mode<synchronous>, transform_indices = @transform_8, window_bounds = array<i64: 32, 32>}, {pipeline_mode = #tpu.pipeline_mode<synchronous>, transform_indices = @transform_9, window_bounds = array<i64: 32, 32>}, {transform_indices = @transform_10, window_bounds = array<i64: 1, 16, 32>}]} {
    %c0 = arith.constant 0 : index
    %c0_0 = arith.constant 0 : index
    %c0_1 = arith.constant 0 : index
    %0 = vector.load %arg2[%c0, %c0_0, %c0_1] : memref<1x16x32xf32, #tpu.memory_space<vmem>>, vector<1x16x32xf32>
    %1 = vector.shape_cast %0 : vector<1x16x32xf32> to vector<16x32xf32>
    %2 = arith.truncf %1 : vector<16x32xf32> to vector<16x32xbf16>
    %c0_2 = arith.constant 0 : index
    %c0_3 = arith.constant 0 : index
    %3 = vector.load %arg5[%c0_2, %c0_3] : memref<32x32xbf16, #tpu.memory_space<vmem>>, vector<32x32xbf16>
    %cst = arith.constant dense<0.000000e+00> : vector<16x32xf32>
    %4 = tpu.matmul %2, %3, %cst {dimension_numbers = #tpu.dot_dimension_numbers<[1], [0], [0], [1], [0, 0, 1, 1], [], []>} : vector<16x32xbf16>, vector<32x32xbf16>, vector<16x32xf32> -> vector<16x32xf32>
    %cst_4 = arith.constant 0.000000e+00 : f32
    %5 = vector.broadcast %cst_4 : f32 to vector<16x32xf32>
    %6 = arith.maximumf %4, %5 : vector<16x32xf32>
    %7 = arith.truncf %6 : vector<16x32xf32> to vector<16x32xbf16>
    %c0_5 = arith.constant 0 : index
    %c0_6 = arith.constant 0 : index
    %8 = vector.load %arg6[%c0_5, %c0_6] : memref<32x12xbf16, #tpu.memory_space<vmem>>, vector<32x12xbf16>
    %cst_7 = arith.constant dense<0.000000e+00> : vector<16x12xf32>
    %9 = tpu.matmul %7, %8, %cst_7 {dimension_numbers = #tpu.dot_dimension_numbers<[1], [0], [0], [1], [0, 0, 1, 1], [], []>} : vector<16x32xbf16>, vector<32x12xbf16>, vector<16x12xf32> -> vector<16x12xf32>
    %c0_8 = arith.constant 0 : index
    %c0_9 = arith.constant 0 : index
    %10 = vector.load %arg7[%c0_8, %c0_9] : memref<1x12xf32, #tpu.memory_space<vmem>>, vector<1x12xf32>
    %11 = vector.broadcast %10 : vector<1x12xf32> to vector<16x12xf32>
    %12 = arith.addf %9, %11 : vector<16x12xf32>
    %13 = arith.truncf %12 : vector<16x12xf32> to vector<16x12xbf16>
    %c0_10 = arith.constant 0 : index
    %c0_11 = arith.constant 0 : index
    %14 = vector.load %arg8[%c0_10, %c0_11] : memref<12x12xbf16, #tpu.memory_space<vmem>>, vector<12x12xbf16>
    %cst_12 = arith.constant dense<0.000000e+00> : vector<16x12xf32>
    %15 = tpu.matmul %13, %14, %cst_12 {dimension_numbers = #tpu.dot_dimension_numbers<[1], [0], [0], [1], [0, 0, 1, 1], [], []>} : vector<16x12xbf16>, vector<12x12xbf16>, vector<16x12xf32> -> vector<16x12xf32>
    %cst_13 = arith.constant 0.333333343 : f32
    %16 = vector.broadcast %cst_13 : f32 to vector<16x12xf32>
    %17 = arith.mulf %15, %16 : vector<16x12xf32>
    %18 = arith.subf %12, %17 : vector<16x12xf32>
    %cst_14 = arith.constant 8.000000e+01 : f32
    %19 = vector.broadcast %cst_14 : f32 to vector<16x12xf32>
    %20 = arith.minimumf %18, %19 : vector<16x12xf32>
    %21 = math.exp %20 : vector<16x12xf32>
    %22 = arith.truncf %21 : vector<16x12xf32> to vector<16x12xbf16>
    %c0_15 = arith.constant 0 : index
    %c0_16 = arith.constant 0 : index
    %23 = vector.load %arg8[%c0_15, %c0_16] : memref<12x12xbf16, #tpu.memory_space<vmem>>, vector<12x12xbf16>
    %cst_17 = arith.constant dense<0.000000e+00> : vector<16x12xf32>
    %24 = tpu.matmul %22, %23, %cst_17 {dimension_numbers = #tpu.dot_dimension_numbers<[1], [0], [0], [1], [0, 0, 1, 1], [], []>} : vector<16x12xbf16>, vector<12x12xbf16>, vector<16x12xf32> -> vector<16x12xf32>
    %25 = tpu.reciprocal %24 {approx = true} : vector<16x12xf32> -> vector<16x12xf32>
    %26 = arith.mulf %21, %25 : vector<16x12xf32>
    %c0_18 = arith.constant 0 : index
    %c0_19 = arith.constant 0 : index
    %c0_20 = arith.constant 0 : index
    %27 = vector.load %arg3[%c0_18, %c0_19, %c0_20] : memref<1x16x32xbf16, #tpu.memory_space<vmem>>, vector<1x16x32xbf16>
    %28 = vector.shape_cast %27 : vector<1x16x32xbf16> to vector<16x32xbf16>
    %c0_21 = arith.constant 0 : index
    %c0_22 = arith.constant 0 : index
    %c0_23 = arith.constant 0 : index
    %29 = vector.load %arg4[%c0_21, %c0_22, %c0_23] : memref<1x8x32xbf16, #tpu.memory_space<vmem>>, vector<1x8x32xbf16>
    %30 = vector.shape_cast %29 : vector<1x8x32xbf16> to vector<8x32xbf16>
    %31 = tpu.concatenate %28, %30 in 0 : vector<16x32xbf16>, vector<8x32xbf16> -> vector<24x32xbf16>
    %c0_24 = arith.constant 0 : index
    %c0_25 = arith.constant 0 : index
    %32 = vector.load %arg10[%c0_24, %c0_25] : memref<32x32xbf16, #tpu.memory_space<vmem>>, vector<32x32xbf16>
    %cst_26 = arith.constant dense<0.000000e+00> : vector<24x32xf32>
    %33 = tpu.matmul %31, %32, %cst_26 {dimension_numbers = #tpu.dot_dimension_numbers<[1], [0], [0], [1], [0, 0, 1, 1], [], []>} : vector<24x32xbf16>, vector<32x32xbf16>, vector<24x32xf32> -> vector<24x32xf32>
    %34 = arith.truncf %26 : vector<16x12xf32> to vector<16x12xbf16>
    %c0_27 = arith.constant 0 : index
    %c0_28 = arith.constant 0 : index
    %35 = vector.load %arg9[%c0_27, %c0_28] : memref<12x96xbf16, #tpu.memory_space<vmem>>, vector<12x96xbf16>
    %cst_29 = arith.constant dense<0.000000e+00> : vector<16x96xf32>
    %36 = tpu.matmul %34, %35, %cst_29 {dimension_numbers = #tpu.dot_dimension_numbers<[1], [0], [0], [1], [0, 0, 1, 1], [], []>} : vector<16x12xbf16>, vector<12x96xbf16>, vector<16x96xf32> -> vector<16x96xf32>
    %37 = vector.extract_strided_slice %36 {offsets = [0, 0], sizes = [16, 32], strides = [1, 1]} : vector<16x96xf32> to vector<16x32xf32>
    %38 = vector.extract_strided_slice %33 {offsets = [0, 0], sizes = [16, 32], strides = [1, 1]} : vector<24x32xf32> to vector<16x32xf32>
    %39 = arith.mulf %37, %38 : vector<16x32xf32>
    %40 = vector.extract_strided_slice %36 {offsets = [0, 32], sizes = [16, 32], strides = [1, 1]} : vector<16x96xf32> to vector<16x32xf32>
    %41 = vector.extract_strided_slice %33 {offsets = [1, 0], sizes = [16, 32], strides = [1, 1]} : vector<24x32xf32> to vector<16x32xf32>
    %42 = arith.mulf %40, %41 : vector<16x32xf32>
    %43 = arith.addf %39, %42 : vector<16x32xf32>
    %44 = vector.extract_strided_slice %36 {offsets = [0, 64], sizes = [16, 32], strides = [1, 1]} : vector<16x96xf32> to vector<16x32xf32>
    %45 = vector.extract_strided_slice %33 {offsets = [2, 0], sizes = [16, 32], strides = [1, 1]} : vector<24x32xf32> to vector<16x32xf32>
    %46 = arith.mulf %44, %45 : vector<16x32xf32>
    %47 = arith.addf %43, %46 : vector<16x32xf32>
    %48 = arith.truncf %47 : vector<16x32xf32> to vector<16x32xbf16>
    %c0_30 = arith.constant 0 : index
    %c0_31 = arith.constant 0 : index
    %49 = vector.load %arg11[%c0_30, %c0_31] : memref<32x32xbf16, #tpu.memory_space<vmem>>, vector<32x32xbf16>
    %cst_32 = arith.constant dense<0.000000e+00> : vector<16x32xf32>
    %50 = tpu.matmul %48, %49, %cst_32 {dimension_numbers = #tpu.dot_dimension_numbers<[1], [0], [0], [1], [0, 0, 1, 1], [], []>} : vector<16x32xbf16>, vector<32x32xbf16>, vector<16x32xf32> -> vector<16x32xf32>
    %c0_33 = arith.constant 0 : index
    %c0_34 = arith.constant 0 : index
    %c0_35 = arith.constant 0 : index
    %51 = vector.load %arg12[%c0_33, %c0_34, %c0_35] : memref<1x16x32xf32, #tpu.memory_space<vmem>>, vector<1x16x32xf32>
    %52 = vector.shape_cast %51 : vector<1x16x32xf32> to vector<16x32xf32>
    %53 = vector.shape_cast %50 : vector<16x32xf32> to vector<1x16x32xf32>
    tpu.vector_store %arg12[%c0_33, %c0_34, %c0_35], %53 {strides = array<i32>} : memref<1x16x32xf32, #tpu.memory_space<vmem>>, vector<1x16x32xf32>,
    return
  }
  func.func @transform_0(%arg0: i32, %arg1: i32) -> (i32, i32, i32) {
    %c0_i32 = arith.constant 0 : i32
    %c0_i32_0 = arith.constant 0 : i32
    return %arg0, %arg1, %c0_i32 : i32, i32, i32
  }
  func.func @transform_1(%arg0: i32, %arg1: i32) -> (i32, i32, i32) {
    %c0_i32 = arith.constant 0 : i32
    %c0_i32_0 = arith.constant 0 : i32
    return %arg0, %arg1, %c0_i32 : i32, i32, i32
  }
  func.func @transform_2(%arg0: i32, %arg1: i32) -> (i32, i32, i32) {
    %c1_i32 = arith.constant 1 : i32
    %0 = arith.addi %arg1, %c1_i32 : i32
    %c2_i32 = arith.constant 2 : i32
    %1 = arith.muli %0, %c2_i32 : i32
    %c0_i32 = arith.constant 0 : i32
    %c0_i32_0 = arith.constant 0 : i32
    return %arg0, %1, %c0_i32 : i32, i32, i32
  }
  func.func @transform_3(%arg0: i32, %arg1: i32) -> (i32, i32) {
    %c0_i32 = arith.constant 0 : i32
    %c0_i32_0 = arith.constant 0 : i32
    %c0_i32_1 = arith.constant 0 : i32
    return %c0_i32, %c0_i32_0 : i32, i32
  }
  func.func @transform_4(%arg0: i32, %arg1: i32) -> (i32, i32) {
    %c0_i32 = arith.constant 0 : i32
    %c0_i32_0 = arith.constant 0 : i32
    %c0_i32_1 = arith.constant 0 : i32
    return %c0_i32, %c0_i32_0 : i32, i32
  }
  func.func @transform_5(%arg0: i32, %arg1: i32) -> (i32, i32) {
    %c0_i32 = arith.constant 0 : i32
    %c0_i32_0 = arith.constant 0 : i32
    %c0_i32_1 = arith.constant 0 : i32
    return %c0_i32, %c0_i32_0 : i32, i32
  }
  func.func @transform_6(%arg0: i32, %arg1: i32) -> (i32, i32) {
    %c0_i32 = arith.constant 0 : i32
    %c0_i32_0 = arith.constant 0 : i32
    %c0_i32_1 = arith.constant 0 : i32
    return %c0_i32, %c0_i32_0 : i32, i32
  }
  func.func @transform_7(%arg0: i32, %arg1: i32) -> (i32, i32) {
    %c0_i32 = arith.constant 0 : i32
    %c0_i32_0 = arith.constant 0 : i32
    %c0_i32_1 = arith.constant 0 : i32
    return %c0_i32, %c0_i32_0 : i32, i32
  }
  func.func @transform_8(%arg0: i32, %arg1: i32) -> (i32, i32) {
    %c0_i32 = arith.constant 0 : i32
    %c0_i32_0 = arith.constant 0 : i32
    %c0_i32_1 = arith.constant 0 : i32
    return %c0_i32, %c0_i32_0 : i32, i32
  }
  func.func @transform_9(%arg0: i32, %arg1: i32) -> (i32, i32) {
    %c0_i32 = arith.constant 0 : i32
    %c0_i32_0 = arith.constant 0 : i32
    %c0_i32_1 = arith.constant 0 : i32
    return %c0_i32, %c0_i32_0 : i32, i32
  }
  func.func @transform_10(%arg0: i32, %arg1: i32) -> (i32, i32, i32) {
    %c0_i32 = arith.constant 0 : i32
    %c0_i32_0 = arith.constant 0 : i32
    return %arg0, %arg1, %c0_i32 : i32, i32, i32
  }
}

</mosaic_0001>

<bundles_post_ra>
// kernel: mhldsa_forward.1
= control target key start
LH: loop header
LB: loop body
LE: loop exit
PB: predicated region body
PF: predicated region fallthrough
CT: control target
= control target key end

     0   :  { %s1631_s0 = inlined_call_operand.vmem [shape: f32[2,16,32], index: 0, kind: input, shape index: {}]   ;;  %s1632_s1 = inlined_call_operand.vmem [shape: bf16[2,32,32], index: 1, kind: input, shape index: {}, may-alias: {1,2}]   ;;  %s1633_s2 = inlined_call_operand.vmem [shape: bf16[2,32,32], index: 2, kind: input, shape index: {}, may-alias: {1,2}]   ;;  %s1634_s3 = inlined_call_operand.vmem [shape: bf16[32,32], index: 3, kind: input, shape index: {}]   ;;  %s1635_s4 = inlined_call_operand.vmem [shape: bf16[32,12], index: 4, kind: input, shape index: {}]   ;;  %s1636_s5 = inlined_call_operand.vmem [shape: f32[1,12], index: 5, kind: input, shape index: {}]   ;;  %s1637_s6 = inlined_call_operand.vmem [shape: bf16[12,12], index: 6, kind: input, shape index: {}]   ;;  %s1638_s7 = inlined_call_operand.vmem [shape: bf16[12,96], index: 7, kind: input, shape index: {}]   ;;  %s1639_s8 = inlined_call_operand.vmem [shape: bf16[32,32], index: 8, kind: input, shape index: {}]   ;;  %s1640_s9 = inlined_call_operand.vmem [shape: bf16[32,32], index: 9, kind: input, shape index: {}]   ;;  %s1641_s10 = inlined_call_operand.hbm [shape: f32[2,16,32], index: 10, kind: output, shape index: {}]  }
   0x1   :  { %1642 = sst [smem:[#allocation5_spill]] %s1631_s0 }
   0x2   :  { %15 = vsyncpa [#allocation3], 0 }
   0x3   :  { %17 = vsyncpa [#allocation3 + $0x1], 0  ;;  %s1434_s13 = smov 0   ;;  %s1436_s14 = smov 0  }
   0x4   :  { %s1438_s15 = smov 0   ;;  %s1440_s16 = smov 0  }
   0x5   :  { %s1442_s17 = smov 0   ;;  %s1444_s18 = smov 0  }
   0x6 LB: > { %s1100_s19 = sadd.s32 4294967295, %s1369_s18   ;;  %s1101_s20 = sadd.s32 4294967294, %s1369_s18   ;;  %s1369_s18 = sphi %s1444_s18, %s23_s18   ;;  %s1365_s17 = sphi %s1442_s17, %s1650_s17   ;;  %s1361_s16 = sphi %s1440_s16, %s1649_s16   ;;  %s1357_s15 = sphi %s1438_s15, %s1648_s15   ;;  %s1353_s14 = sphi %s1436_s14, %s1647_s14   ;;  %s1349_s13 = sphi %s1434_s13, %s1646_s13  }
   0x7   : > { %s35_s21 = sadd.s32 1, %s1365_s17  ;;  %s279_s22 = sadd.s32 1, %s1357_s15 }
   0x8   : > { %p37_p0 = scmp.ge.s32.totalorder %s35_s21, 2  ;;  %p289_p1 = scmp.ne.s32.totalorder %s1357_s15, %s1353_s14 }
   0x9   : > { %p290_p2 = scmp.eq.s32.totalorder %s1100_s19, 1  ;;  %p295_p3 = scmp.ne.s32.totalorder %s1353_s14, %s1349_s13 }
   0xa   : > { %s1652_s21 = smov (%p37_p0, %s35_s21), 0  ;;  %p296_p5 = scmp.eq.s32.totalorder %s1101_s20, 1 }
   0xb   : > { %p1474_p4 = por %p290_p2, %p289_p1  ;;  %s274_s24 = ssub.s32 %s1365_s17, %s1652_s21 }
   0xc   : > { %p1104_p6 = scmp.ge.s32.totalorder %s1369_s18, 1  ;;  %p277_p7 = scmp.eq.s32.totalorder %s274_s24, 0 }
   0xd   : > { %p1481_p8 = por %p296_p5, %p295_p3  ;;  %p376_p9 = scmp.lt.s32.totalorder %s1369_s18, 3 }
   0xe   : > { %s1487_s26 = scalar_select %p277_p7, %s1357_s15, %s279_s22  }
   0xf   : > { %p377_p10 = pnand %p1104_p6, %p376_p9 }
  0x10   : > { %p438_p11 = scmp.lt.s32.totalorder (!%p377_p10), %s1361_s16, 1  ;;  %s1645_s0 = sld [smem:[#allocation5_spill]] (!%p377_p10) }
  0x11   : > { %380 = sbr.rel (%p377_p10) target bundleno = 1403 (0x57b), region = 60  ;;  %s1373_s24 = smov (!%p377_p10), 64  }
  0x12   : > { %s1374_s27 = smov (!%p377_p10), 32   ;;  %s434_s20 = sand.u32 (!%p377_p10), 1, %s1353_s14  }
  0x13   : > { %s1586_s30 = scalar_lea.sflag (!%p377_p10), [#allocation3], %s434_s20 }
  0x16   : > { %v1274_v0 = vld [vmem:[%s1634_s3 + $0x8] sm:$0xff]   ;;  %v1371_v1 = vmov 0.0   ;;  %v1275_v2 = vld [vmem:[%s1634_s3] sm:$0xff]   ;;  %vm1372_vm0 = vmmov 0   ;;  %s439_s11 = scalar_select %p438_p11, %s1361_s16, 1  ;;  %vm490_vm1 = vcmask 261120  }
  0x17   : > { %1162 = vmatprep.subr.bf16.mxu0 %v1371_v1  ;;  %1170 = vmatprep.subr.bf16.mxu1 %v1371_v1  ;;  %v1276_v6 = vld [vmem:[%s1635_s4 + $0x8] sm:$0xff]   ;;  %v1277_v7 = vld [vmem:[%s1635_s4] sm:$0xff]   ;;  %vm617_vm2 = vcmask 1045504   ;;  %vm613_vm3 = vcmask 97280   ;;  %vm859_vm4 = vcmask 1046528  }
  0x18   : > { %1163 = vmatpush3.bf16.msra.mxu0 %v1274_v0  ;;  %1166 = vmatprep.mubr.msk.bf16.mxu0 %vm1372_vm0, %v1371_v1  ;;  %s1504_s12 = sshll.u32 %s439_s11, 4  ;;  %v1278_v15 = vld [vmem:[%s1637_s6] sm:$0x3f]   ;;  %v1279_v25 = vld [vmem:[%s1639_s8 + $0x8] sm:$0xff]  }
  0x19   : > { %1164 = vmatprep.subr.bf16.mxu0 %v1371_v1  ;;  %1174 = vmatprep.mubr.msk.bf16.mxu1 %vm1372_vm0, %v1371_v1  ;;  %s445_s22 = scalar_lea.vmem %s1645_s0, %s1504_s12  ;;  %v619_v16 = vsel %vm617_vm2, %v1278_v15, 0  ;;  %v1115_v18 = vld [vmem:[%s1636_s5] ss:$0 sm:$0xff]  ;;  %s455_s11 = scalar_lea.vmem %s1632_s1, %s1504_s12 }
  0x1a   : > { %v471_v3 = vld [vmem:[%s445_s22] sm:$0xff]  ;;  %v472_v4 = vld [vmem:[%s445_s22 + $0x8] sm:$0xff]  ;;  %1171 = vmatpush3.bf16.msra.mxu1 %v1276_v6  ;;  %s1140_s19 = sadd.s32 8, %s1504_s12 }
  0x1b   : > { %v473_v5 = vpack.c.bf16 %v472_v4, %v471_v3  ;;  %1172 = vmatprep.subr.bf16.mxu1 %v1371_v1  ;;  %v1280_v26 = vld [vmem:[%s1639_s8] sm:$0xff]   ;;  %s466_s22 = scalar_lea.vmem %s1633_s2, %s1140_s19  ;;  %v1283_v6 = vld [vmem:[%s1640_s9 + $0x8] sm:$0xff]   ;;  %s1375_s19 = smov 96  }
  0x1c   : > { %1165 = vmatpush3.bf16.msra.mxu0 %v1275_v2  ;;  %v1281_v27 = vld [vmem:[%s455_s11] sm:$0xff]   ;;  %s1376_s11 = smov [#allocation2]  }
  0x1d   : > { %1178 = vmatprep.subr.bf16.mxu0 %v1371_v1  ;;  %v723_v28 = vld [vmem:[%s466_s22] sm:$0xf]  ;;  %s1105_s22 = sshll.u32 %s434_s20, 4 }
  0x1e   : > { %1173 = vmatpush3.bf16.msra.mxu1 %v1277_v7  ;;  %v1282_v44 = vld [vmem:[%s1638_s7] sm:$0x3f]   ;;  %s436_s0 = scalar_lea.vmem [#allocation2], %s1105_s22 }
  0x1f   : > { %1167 = vmatmul.mubr.msk.bf16.vlgmr.msra.gmra.mxu0 %vm490_vm1, %v473_v5  ;;  %1184 = vmatprep.subr.bf16.mxu1 %v1371_v1  ;;  %v811_v45 = vsel %vm617_vm2, %v1282_v44, 0  ;;  %v1284_v7 = vld [vmem:[%s1640_s9] sm:$0xff]   ;;  %s985_s12 = sshll.u32 %s436_s0, 4  ;;  %s1578_s12 = int_to_ptr.vmem [resolvable:$true] %s985_s12 }
  0x20   : > { %1180 = vmatprep.mubr.msk.bf16.mxu0 %vm1372_vm0, %v1371_v1  ;;  %1179 = vmatpush3.bf16.msra.mxu0 %v619_v16 }
  0x21   : > { %1190 = vmatprep.subr.bf16.mxu0 %v1279_v25 }
  0xdf   : > { %v528_v8 = vpop.f32.mrf.mxu0 }
  0xe0   : > { %v535_v11 = vmax.f32 %v528_v8, 0.0 }
  0xe1   : > { %v1168_v9 = vpop.f32.mrf.mxu0 }
  0xe3   : > { %v531_v10 = vpop.f32.mrf.mxu0 }
  0xe4   : > { %v536_v12 = vmax.f32 %v531_v10, 0.0 }
  0xe5   : > { %v1169_v13 = vpop.f32.mrf.mxu0 }
  0xe6   : > { %v537_v14 = vpack.c.bf16 %v536_v12, %v535_v11 }
  0xe8   : > { %1175 = vmatmul.mubr.msk.bf16.vlgmr.msra.gmra.mxu1 %vm490_vm1, %v537_v14 }
  0xe9   : > { %1186 = vmatprep.mubr.msk.bf16.mxu1 %vm1372_vm0, %v1371_v1  ;;  %1185 = vmatpush3.bf16.msra.mxu1 %v619_v16 }
  0xea   : > { %1198 = vmatprep.subr.bf16.mxu1 %v1371_v1 }
 0x1a8   : > { %v598_v17 = vpop.f32.mrf.mxu1 }
 0x1a9   : > { %v599_v21 = vadd.f32 %v1115_v18, %v598_v17 }
 0x1aa   : > { %v1176_v19 = vpop.f32.mrf.mxu1 }
 0x1ac   : > { %v601_v20 = vpop.f32.mrf.mxu1 }
 0x1ad   : > { %v602_v22 = vadd.f32 %v1115_v18, %v601_v20 }
 0x1ae   : > { %v1177_v23 = vpop.f32.mrf.mxu1 }
 0x1af   : > { %v605_v24 = vpack.c.bf16 %v602_v22, %v599_v21 }
 0x1b1   : > { %1181 = vmatmul.mubr.msk.bf16.vlgmr.msra.gmra.mxu0 %vm613_vm3, %v605_v24 }
 0x1b2   : > { %1191 = vmatpush3.bf16.msra.mxu0 %v1279_v25  ;;  %1194 = vmatprep.mubr.msk.bf16.mxu0 %vm490_vm1, %v1281_v27 }
 0x1b3   : > { %1192 = vmatprep.subr.bf16.mxu0 %v1280_v26 }
 0x1b6   : > { %1193 = vmatpush3.bf16.msra.mxu0 %v1280_v26 }
 0x1b7   : > { %1204 = vmatprep.subr.bf16.mxu0 %v1371_v1 }
 0x1b9   : > { %1195 = vmatmul.mubr.msk.bf16.vlgmr.msra.gmra.mxu0 %vm490_vm1, %v723_v28 }
 0x1ba   : > { %1208 = vmatprep.mubr.msk.bf16.mxu0 %vm1372_vm0, %v1371_v1  ;;  %1205 = vmatpush3.bf16.msra.mxu0 %v1283_v6 }
 0x1bb   : > { %1206 = vmatprep.subr.bf16.mxu0 %v1371_v1 }
 0x1be   : > { %1207 = vmatpush3.bf16.msra.mxu0 %v1284_v7 }
 0x271   : > { %v655_v29 = vpop.f32.mrf.mxu0 }
 0x272   : > { %v662_v30 = vmul.f32 0.33333334, %v655_v29 }
 0x273   : > { %v1182_v31 = vpop.f32.mrf.mxu0 }
 0x274   : > { %v664_v32 = vsub.f32 %v599_v21, %v662_v30 }
 0x275   : > { %v658_v33 = vpop.f32.mrf.mxu0 }
 0x276   : > { %v666_v34 = vmin.f32 %v664_v32, 80.0  ;;  %v663_v35 = vmul.f32 0.33333334, %v658_v33 }
 0x277   : > { %v1183_v36 = vpop.f32.mrf.mxu0 }
 0x278   : > { %v665_v37 = vsub.f32 %v602_v22, %v663_v35  ;;  %v668_v38 = vmul.f32 1.442695, %v666_v34 }
 0x279   : > { %v1196_v46 = vpop.f32.mrf.mxu0 }
 0x27a   : > { %v667_v39 = vmin.f32 %v665_v37, 80.0  ;;  %1285 = vpow2.f32 %v668_v38  ;;  %v863_v52 = vrot.slane %v1196_v46, 1  ;;  %v886_v53 = vrot.slane %v1196_v46, 2 }
 0x27b   : > { %v785_v47 = vpop.f32.mrf.mxu0 }
 0x27c   : > { %v670_v40 = vmul.f32 1.442695, %v667_v39  ;;  %v860_v49 = vrot.slane %v785_v47, 1  ;;  %v883_v50 = vrot.slane %v785_v47, 2 }
 0x27d   : > { %v1197_v48 = vpop.f32.mrf.mxu0 }
 0x27e   : > { %1287 = vpow2.f32 %v670_v40 }
 0x27f   : > { %v788_v51 = vpop.f32.mrf.mxu0 }
 0x280   : > { %v861_v54 = vrot.slane %v788_v51, 1  ;;  %v884_v55 = vrot.slane %v788_v51, 2 }
 0x282   : > { %v885_v56 = vsel %vm617_vm2, %v883_v50, %v884_v55  ;;  %v862_v57 = vsel %vm859_vm4, %v860_v49, %v861_v54  ;;  %v887_v58 = vsel %vm617_vm2, %v884_v55, %v886_v53  ;;  %v864_v59 = vsel %vm859_vm4, %v861_v54, %v863_v52 }
 0x283   : > { %888 = vrot.lane.b32.xlu1 %v885_v56, %s1373_s24  ;;  %865 = vrot.lane.b32.xlu0 %v862_v57, %s1374_s27 }
 0x287   : > { %v1286_v41 = vpop.eup %1285  ;;  %890 = vrot.lane.b32.xlu1 %v887_v58, %s1373_s24  ;;  %867 = vrot.lane.b32.xlu0 %v864_v59, %s1374_s27 }
 0x28b   : > { %v1288_v42 = vpop.eup %1287 }
 0x28c   : > { %v672_v43 = vpack.c.bf16 %v1288_v42, %v1286_v41 }
 0x28e   : > { %1187 = vmatmul.mubr.msk.bf16.vlgmr.msra.gmra.mxu1 %vm613_vm3, %v672_v43 }
 0x28f   : > { %1200 = vmatprep.mubr.msk.bf16.mxu1 %vm1372_vm0, %v1371_v1  ;;  %1199 = vmatpush3.bf16.msra.mxu1 %v811_v45 }
 0x2f5   : > { %v866_v8 = vpop.permute.xlu0 %865  ;;  %v889_v11 = vpop.permute.xlu1 %888 }
 0x2f9   : > { %v868_v13 = vpop.permute.xlu0 %867  ;;  %v891_v1 = vpop.permute.xlu1 %890 }
 0x34e   : > { %v710_v60 = vpop.f32.mrf.mxu1 }
 0x34f   : > { %1289 = vrcp.f32 %v710_v60 }
 0x350   : > { %v1188_v61 = vpop.f32.mrf.mxu1 }
 0x352   : > { %v713_v62 = vpop.f32.mrf.mxu1 }
 0x353   : > { %1291 = vrcp.f32 %v713_v62 }
 0x354   : > { %v1189_v63 = vpop.f32.mrf.mxu1 }
 0x35c   : > { %v1290_v0 = vpop.eup %1289 }
 0x35d   : > { %v719_v3 = vmul.f32 %v1290_v0, %v1286_v41 }
 0x360   : > { %v1292_v2 = vpop.eup %1291 }
 0x361   : > { %v720_v4 = vmul.f32 %v1292_v2, %v1288_v42 }
 0x363   : > { %v799_v5 = vpack.c.bf16 %v720_v4, %v719_v3 }
 0x365   : > { %1201 = vmatmul.mubr.msk.bf16.vlgmr.msra.gmra.mxu1 %vm613_vm3, %v799_v5 }
 0x425   : > { %v847_v9 = vpop.f32.mrf.mxu1 }
 0x426   : > { %v871_v10 = vmul.f32 %v866_v8, %v847_v9  ;;  %v894_v15 = vmul.f32 %v889_v11, %v847_v9  ;;  %v854_v21 = vmul.f32 %v847_v9, %v785_v47 }
 0x427   : > { %v1202_v12 = vpop.f32.mrf.mxu1 }
 0x428   : > { %875 = vrot.lane.b32.xlu0 %v871_v10, %s1375_s19 }
 0x429   : > { %v850_v14 = vpop.f32.mrf.mxu1 }
 0x42a   : > { %v872_v16 = vmul.f32 %v868_v13, %v850_v14  ;;  %v895_v18 = vmul.f32 %v891_v1, %v850_v14  ;;  %v855_v22 = vmul.f32 %v850_v14, %v788_v51 }
 0x42b   : > { %v1203_v17 = vpop.f32.mrf.mxu1 }
 0x42c   : > { %898 = vrot.lane.b32.xlu0 %v894_v15, %s1373_s24  ;;  %877 = vrot.lane.b32.xlu1 %v872_v16, %s1375_s19  ;;  %s1297_s19 = sshll.u32 %s1376_s11, 4  ;;  %s1298_s19 = int_to_ptr.vmem [resolvable:$false] %s1297_s19 }
 0x42d   : > { %s1299_s22 = scalar_lea.vmem %s1298_s19, 512  ;;  %p1300_p1 = scmp.lt.s32.totalorder %s1578_s12, %s1298_s19 }
 0x430   : > { %900 = vrot.lane.b32.xlu1 %v895_v18, %s1373_s24  ;;  %s1141_s24 = sshll.u32 %s1361_s16, 8  ;;  %s1293_s16 = scalar_lea.vmem %s1578_s12, 256 }
 0x431   : > { %s1583_s29 = scalar_lea.hbm %s1641_s10, %s1141_s24  ;;  %p1294_p12 = scmp.ne.s32.totalorder %s1578_s12, %s1293_s16 }
 0x432   : > { %p1301_p2 = scmp.lt.s32.totalorder %s1299_s22, %s1293_s16 }
 0x433   : > { %p1295_p13 = pnand %p1294_p12, %p1474_p4 }
 0x434   : > { %p1302_p3 = por %p1301_p2, %p1300_p1 }
 0x435   : > { %p1296_p0 = pneg %p1295_p13 }
 0x437   : > { %p1303_p5 = pnand %p1302_p3, %p1296_p0 }
 0x49a   : > { %v876_v19 = vpop.permute.xlu0 %875 }
 0x49b   : > { %v881_v24 = vadd.f32 %v876_v19, %v854_v21 }
 0x49e   : > { %v878_v20 = vpop.permute.xlu1 %877  ;;  %v899_v23 = vpop.permute.xlu0 %898 }
 0x49f   : > { %v882_v25 = vadd.f32 %v878_v20, %v855_v22  ;;  %v904_v27 = vadd.f32 %v899_v23, %v881_v24 }
 0x4a2   : > { %v901_v26 = vpop.permute.xlu1 %900 }
 0x4a3   : > { %v905_v28 = vadd.f32 %v901_v26, %v882_v25 }
 0x4a5   : > { %v906_v29 = vpack.c.bf16 %v905_v28, %v904_v27 }
 0x4a7   : > { %1209 = vmatmul.mubr.msk.bf16.vlgmr.msra.gmra.mxu0 %vm490_vm1, %v906_v29 }
 0x567   : > { %v960_v30 = vpop.f32.mrf.mxu0 }
 0x568   : > { %967 = vst.msk [vmem:[%s436_s0] sm:$0xff] %vm490_vm1, %v960_v30 }
 0x569   : > { %v1210_v31 = vpop.f32.mrf.mxu0 }
 0x56b   : > { %v963_v32 = vpop.f32.mrf.mxu0 }
 0x56c   : > { %968 = vst.msk [vmem:[%s436_s0 + $0x8] sm:$0xff] %vm490_vm1, %v963_v32 }
 0x56d   : > { %v1211_v33 = vpop.f32.mrf.mxu0 }
 0x56e   : > { %1306 = shalt.err (!%p1303_p5)
}
 0x56f   : > { %s1307_s20 = scalar_lea.hbm %s1583_s29, 256  ;;  %s1311_s27 = scalar_lea.hbm %s1641_s10, 512 }
 0x570   : > { %p1308_p6 = scmp.ne.s32.totalorder %s1583_s29, %s1307_s20  ;;  %p1312_p10 = scmp.lt.s32.totalorder %s1583_s29, %s1641_s10 }
 0x571   : > { %p1313_p11 = scmp.lt.s32.totalorder %s1311_s27, %s1307_s20 }
 0x572   : > { %p1309_p7 = pnand %p1308_p6, %p1474_p4 }
 0x573   : > { %p1314_p12 = por %p1313_p11, %p1312_p10 }
 0x574   : > { %p1310_p9 = pneg %p1309_p7 }
 0x576   : > { %p1315_p13 = pnand %p1314_p12, %p1310_p9 }
 0x578   : > { %1318 = shalt.err (!%p1315_p13)
}
 0x579   : > { %s1377_s16 = smov 128   ;;  %s1378_s19 = smov 8  }
 0x57a   : > { %1212 = dma.vmem_to_hbm [thread:$0]  (%p1474_p4), %s1578_s12, 256, %s1583_s29, %s1586_s30, %s1377_s16, %s1377_s16, %s1378_s19  }
 0x57b PF: > { %p1218_p0 = scmp.ge.s32.totalorder %s1369_s18, 2  ;;  %s1000_s22 = sand.u32 1, %s1349_s13  }
 0x57c   : > { %s1001_s20 = scalar_lea.sflag [#allocation3], %s1000_s22 }
 0x57d   : > { %p1215_p1 = pnand %p1218_p0, %p1481_p8 }
 0x57f   : > { %p1216_p2 = pneg %p1215_p1 }
 0x581   : > { %1344 = dma.done.wait (%p1216_p2), %s1001_s20, 256  }
 0x582   : > { %1346 = vsyncadd (%p1216_p2), %s1001_s20, 4294967040  ;;  %s23_s18 = sadd.s32 1, %s1369_s18   ;;  %s1646_s13 = smov %s1353_s14 }
 0x583   : > { %p20_p3 = scmp.ge.s32.totalorder %s23_s18, 4   ;;  %s1647_s14 = smov %s1357_s15 }
 0x584   : > { %s1648_s15 = smov %s1487_s26  ;;  %s1649_s16 = smov %s1365_s17 }
 0x585   : > { %s1650_s17 = smov %s1652_s21  ;;  %22 = sbr.rel (!%p20_p3) target bundleno = 6 (0x6), region = 101 }
 0x58a   :  { %1006 = vsyncpa [#allocation3], 1 }
 0x58b   :  { %1008 = vsyncpa [#allocation3 + $0x1], 1 }

</bundles_post_ra>
